<compile_context>
chip_gen: v7x
topology: tpu7x:2x2x1
jax: 0.10.0
libtpu: 0.0.40
codegen_flags: <defaults>
</compile_context>

<pallas_src>
import numpy as np
import jax
import jax.numpy as jnp
from jax.experimental import pallas as pl
from jax.experimental.pallas import tpu as pltpu


def build_pe(max_len: int, d_model: int) -> jnp.ndarray:
    """Deterministic sin/cos positional-encoding buffer, shape (1, max_len, d_model)."""
    position = np.arange(0, max_len, dtype=np.float32)[:, None]            # (max_len, 1)
    div_term = np.exp(
        np.arange(0, d_model, 2, dtype=np.float32) * (-np.log(10000.0) / d_model)
    )
    pe = np.zeros((max_len, d_model), dtype=np.float32)
    pe[:, 0::2] = np.sin(position * div_term)
    if d_model % 2 != 0:
        pe[:, 1::2] = np.cos(position * div_term)[:, :-1]
    else:
        pe[:, 1::2] = np.cos(position * div_term)
    return jnp.asarray(pe[None, :, :])                                      # (1, max_len, d_model)


def _add_pe_kernel(x_ref, pe_ref, o_ref):
    # x_ref / o_ref : (ts, tn) tile of the flattened (S, B*D) rows.
    # pe_ref        : (1, tn) block, constant across the row grid axis.
    # Pure VPU sublane-broadcast add; fully hidden under the DMA streams.
    o_ref[...] = (x_ref[...] + pe_ref[...]).astype(o_ref.dtype)


def _round_up(x: int, m: int) -> int:
    return -(-x // m) * m


def _hw_config():
    """Per-generation sizing: v5e/v6e = 128 MiB VMEM / 1 TC; v7x = 64 MiB / 2 TC."""
    vmem_cap = 64 << 20                      # conservative (v7x-like) fallback
    try:
        info = pltpu.get_tpu_info()
        vmem_cap = int(getattr(info, "vmem_capacity_bytes", vmem_cap))
    except Exception:
        pass
    if vmem_cap >= (128 << 20):              # v5e / v6e
        return {"vmem_limit": 64 << 20, "budget": 24 << 20, "min_row_steps": 1}
    # v7x: half the VMEM per TC, but 2 TCs per chip -> want >= 2 grid steps.
    return {"vmem_limit": 48 << 20, "budget": 16 << 20, "min_row_steps": 2}


def _choose_tiles(S, BD, x_itemsize, out_itemsize, vmem_budget_bytes, min_row_steps):
    """Pick (row_tile, lane_tile) so 2 double-buffered (x, out) blocks fit the budget."""
    # Native sublane packing of the narrowest dtype in play: 8 (f32), 16 (bf16), 32 (int8/fp8).
    sublane = max(8, 32 // min(x_itemsize, out_itemsize))
    # x block + out block, each double-buffered by the pipeline.
    elem_bytes = 2 * (x_itemsize + out_itemsize)
    block_elems = max(vmem_budget_bytes // elem_bytes, sublane * 128)

    # Lane (last-dim) tile: prefer the full row (lane-dense, one column step);
    # otherwise a multiple of 128 so wide rows never blow the VMEM budget.
    if BD <= 128 or sublane * BD <= block_elems:
        tn = BD                                           # full extent (always legal)
    else:
        tn = max(128, (block_elems // sublane) // 128 * 128)
        tn = min(tn, BD)                                  # < BD here, multiple of 128

    # Row (second-to-last) tile: as many rows as the budget allows, sublane aligned.
    ts = max(sublane, (block_elems // tn) // sublane * sublane)
    if min_row_steps > 1 and S > sublane:
        # v7x: force >= 2 row steps so both TensorCores get work.
        ts = min(ts, _round_up(pl.cdiv(S, min_row_steps), sublane))
    if ts >= S:
        ts = S
    else:
        # Re-balance so the trailing partial block isn't badly padded.
        nsteps = pl.cdiv(S, ts)
        ts = min(S, _round_up(pl.cdiv(S, nsteps), sublane))
    return ts, tn


def positional_encoding_forward(
    x: jnp.ndarray,
    pe: jnp.ndarray,
    *,
    vmem_budget_bytes: int | None = None,
    force_pallas: bool = False,
    small_input_bytes: int = 1 << 20,
) -> jnp.ndarray:
    """x: [S, B, D];  pe: [1, max_len, D];  requires B == max_len (as in PyTorch)."""
    S, B, D = x.shape
    # Mirrors `self.pe[:x.size(0), :]` on the (1, max_len, d_model) buffer.
    pe_slice = pe[: min(S, 1)]
    assert pe_slice.shape == (1, B, D), (
        "PyTorch broadcasting of pe (1, max_len, d_model) against x (S, B, D) "
        "requires batch == max_len; got pe %s vs x %s" % (pe_slice.shape, x.shape)
    )

    out_dtype = jnp.promote_types(x.dtype, pe_slice.dtype)   # torch-style promotion
    total_bytes = x.size * jnp.dtype(x.dtype).itemsize

    # Fast path: tiny inputs (the module's own default shapes are ~16 KiB) are
    # pure launch overhead for a standalone kernel; let XLA fuse the add.
    if (not force_pallas) and total_bytes < small_input_bytes:
        return (x + pe_slice).astype(out_dtype)

    hw = _hw_config()
    budget = hw["budget"] if vmem_budget_bytes is None else vmem_budget_bytes
    min_steps = hw["min_row_steps"] if total_bytes >= (4 << 20) else 1

    BD = B * D
    x_it = jnp.dtype(x.dtype).itemsize
    out_it = jnp.dtype(out_dtype).itemsize
    ts, tn = _choose_tiles(S, BD, x_it, out_it, budget, min_steps)

    # Lane-dense layout: rows = sequence positions, last dim = B*D.
    x_flat = x.reshape(S, BD)
    pe_flat = pe_slice.reshape(1, BD)           # keep pe dtype; promotion happens in-kernel

    grid = (pl.cdiv(S, ts), pl.cdiv(BD, tn))
    # Only alias when the output buffer is bit-compatible with x (same dtype).
    aliases = {0: 0} if jnp.dtype(out_dtype) == jnp.dtype(x.dtype) else {}

    out_flat = pl.pallas_call(
        _add_pe_kernel,
        out_shape=jax.ShapeDtypeStruct((S, BD), out_dtype),
        grid_spec=pltpu.PrefetchScalarGridSpec(
            num_scalar_prefetch=0,
            grid=grid,
            in_specs=[
                pl.BlockSpec((ts, tn), lambda i, j: (i, j)),   # x rows/lanes for (i, j)
                pl.BlockSpec((1, tn), lambda i, j: (0, j)),    # pe: constant over rows
            ],
            out_specs=pl.BlockSpec((ts, tn), lambda i, j: (i, j)),
        ),
        compiler_params=pltpu.CompilerParams(
            dimension_semantics=("parallel", "parallel"),       # shards across v7x's 2 TCs
            vmem_limit_bytes=hw["vmem_limit"],
        ),
        input_output_aliases=aliases,
    )(x_flat, pe_flat)

    return out_flat.reshape(S, B, D)


if __name__ == "__main__":
    # Shapes consistent with the module: d_model=32, max_len=16, seq_len=8,
    # batch=16 (batch must equal max_len — see semantics note above).
    d_model = 32
    max_len = 16
    seq_len = 8
    batch = max_len

    key = jax.random.PRNGKey(0)
    x = jax.random.normal(key, (seq_len, batch, d_model), dtype=jnp.float32)
    pe = build_pe(max_len, d_model)
    ref = x + pe[: min(seq_len, 1)]                 # eval-mode dropout = identity

    # 1) Pallas kernel path at the module's own (tiny) shapes.
    out = jax.block_until_ready(positional_encoding_forward(x, pe, force_pallas=True))
    assert out.shape == (seq_len, batch, d_model) and out.dtype == jnp.float32
    np.testing.assert_allclose(np.asarray(out), np.asarray(ref), rtol=1e-6, atol=1e-6)

    # 2) Default call hits the small-input fast path (no pallas launch).
    out_fast = jax.block_until_ready(positional_encoding_forward(x, pe))
    np.testing.assert_allclose(np.asarray(out_fast), np.asarray(ref), rtol=1e-6, atol=1e-6)

    # 3) Longer sequence + tiny VMEM budget: exercises the 2-D (row, lane) grid
    #    with lane tiling and a padded trailing row block.
    seq_len2 = 20
    x2 = jax.random.normal(jax.random.PRNGKey(1), (seq_len2, batch, d_model),
                           dtype=jnp.float32)
    out2 = jax.block_until_ready(
        positional_encoding_forward(x2, pe, vmem_budget_bytes=32 * 1024, force_pallas=True)
    )
    ref2 = x2 + pe[: min(seq_len2, 1)]
    np.testing.assert_allclose(np.asarray(out2), np.asarray(ref2), rtol=1e-6, atol=1e-6)

    # 4) bf16 input: result follows torch promotion (bf16 x + f32 pe -> f32 out).
    x3 = x.astype(jnp.bfloat16)
    out3 = jax.block_until_ready(positional_encoding_forward(x3, pe, force_pallas=True))
    assert out3.dtype == jnp.float32
    ref3 = x3.astype(jnp.float32) + pe[: min(seq_len, 1)]
    np.testing.assert_allclose(np.asarray(out3), np.asarray(ref3), rtol=1e-6, atol=1e-6)

    print("KERNEL_OK")
</pallas_src>

<mosaic_0001>
module attributes {stable_mosaic.version = 11 : i64} {
  func.func @_add_pe_kernel(%arg0: i32, %arg1: i32, %arg2: memref<8x512xf32, #tpu.memory_space<vmem>>, %arg3: memref<1x512xf32, #tpu.memory_space<vmem>>, %arg4: memref<8x512xf32, #tpu.memory_space<vmem>>) attributes {dimension_semantics = [#tpu.dimension_semantics<parallel>, #tpu.dimension_semantics<parallel>], iteration_bounds = array<i64: 1, 1>, scalar_prefetch = 0 : i64, scratch_operands = 0 : i64, tpu.core_type = #tpu.core_type<tc>, window_params = [{transform_indices = @transform_0, window_bounds = array<i64: 8, 512>}, {transform_indices = @transform_1, window_bounds = array<i64: 1, 512>}, {transform_indices = @transform_2, window_bounds = array<i64: 8, 512>}]} {
    %c0 = arith.constant 0 : index
    %c0_0 = arith.constant 0 : index
    %0 = vector.load %arg2[%c0, %c0_0] : memref<8x512xf32, #tpu.memory_space<vmem>>, vector<8x512xf32>
    %c0_1 = arith.constant 0 : index
    %c0_2 = arith.constant 0 : index
    %1 = vector.load %arg3[%c0_1, %c0_2] : memref<1x512xf32, #tpu.memory_space<vmem>>, vector<1x512xf32>
    %2 = vector.broadcast %1 : vector<1x512xf32> to vector<8x512xf32>
    %3 = arith.addf %0, %2 : vector<8x512xf32>
    %c0_3 = arith.constant 0 : index
    %c0_4 = arith.constant 0 : index
    %4 = vector.load %arg4[%c0_3, %c0_4] : memref<8x512xf32, #tpu.memory_space<vmem>>, vector<8x512xf32>
    tpu.vector_store %arg4[%c0_3, %c0_4], %3 {strides = array<i32>} : memref<8x512xf32, #tpu.memory_space<vmem>>, vector<8x512xf32>,
    return
  }
  func.func @transform_0(%arg0: i32, %arg1: i32) -> (i32, i32) {
    %c0_i32 = arith.constant 0 : i32
    return %arg0, %arg1 : i32, i32
  }
  func.func @transform_1(%arg0: i32, %arg1: i32) -> (i32, i32) {
    %c0_i32 = arith.constant 0 : i32
    %c0_i32_0 = arith.constant 0 : i32
    return %c0_i32, %arg1 : i32, i32
  }
  func.func @transform_2(%arg0: i32, %arg1: i32) -> (i32, i32) {
    %c0_i32 = arith.constant 0 : i32
    return %arg0, %arg1 : i32, i32
  }
}

</mosaic_0001>

<bundles_post_ra>
// kernel: tpu_custom_call.1
= control target key start
LH: loop header
LB: loop body
LE: loop exit
PB: predicated region body
PF: predicated region fallthrough
CT: control target
= control target key end

     0   :  { %7 = vsyncpa [#allocation3], 0  ;;  %s167_s0 = inlined_call_operand.hbm [shape: f32[8,512], index: 0, kind: input, shape index: {}, may-alias: {0,2}]   ;;  %s168_s1 = inlined_call_operand.vmem [shape: f32[1,512], index: 1, kind: input, shape index: {}]   ;;  %s169_s2 = inlined_call_operand.hbm [shape: f32[8,512], index: 2, kind: output, shape index: {}, may-alias: {0,2}]  }
   0x1   :  { %8 = vsyncpa [#allocation4], 0  ;;  %s123_s9 = smov [#allocation2]   ;;  %s75_s13 = scalar_lea.hbm %s167_s0, 512 }
   0x2   :  { %s15_s10 = sshll.u32 %s123_s9, 4  ;;  %p76_p0 = scmp.ne.s32.totalorder %s167_s0, %s75_s13  ;;  %s16_s10 = int_to_ptr.vmem [resolvable:$true] %s15_s10 }
   0x3   :  { %p79_p1 = scmp.lt.u32.totalorder %s75_s13, %s167_s0 }
   0x5   :  { %p81_p2 = pnand %p79_p1, %p76_p0 }
   0x7   :  { %84 = shalt.err (!%p81_p2)
}
   0x8   :  { %s85_s18 = scalar_lea.vmem %s16_s10, 512  ;;  %p90_p4 = scmp.lt.s32.totalorder %s16_s10, %s16_s10 }
   0x9   :  { %p86_p3 = scmp.ne.s32.totalorder %s16_s10, %s85_s18  ;;  %p91_p5 = scmp.lt.s32.totalorder %s85_s18, %s85_s18 }
   0xb   :  { %p92_p6 = por %p91_p5, %p90_p4 }
   0xd   :  { %p93_p7 = pnand %p92_p6, %p86_p3 }
   0xf   :  { %96 = shalt.err (!%p93_p7)
}
  0x10   :  { %18 = dma.hbm_to_vmem [thread:$0]  %s167_s0, 512, %s16_s10, [#allocation3]  }
  0x11   :  { %119 = dma.done.wait [#allocation3], 512  }
  0x12   :  { %120 = vsyncadd [#allocation3], 4294966784  ;;  %v30_v0 = vlaneseq  ;;  %v24_v6 = vld [vmem:[#allocation2] sm:$0xff]  ;;  %v25_v8 = vld [vmem:[#allocation2 + $0x8] sm:$0xff]  ;;  %s124_s23 = smov [#allocation5]  }
  0x13   :  { %v28_v7 = vld [vmem:[%s168_s1] sm:$0xf]  ;;  %s64_s24 = sshll.u32 %s124_s23, 4  ;;  %v26_v11 = vld [vmem:[#allocation2 + $0x10] sm:$0xff]  ;;  %v27_v13 = vld [vmem:[#allocation2 + $0x18] sm:$0xff]  ;;  %s65_s24 = int_to_ptr.vmem [resolvable:$true] %s64_s24 }
  0x14   :  { %v31_v1 = vshrl.u32 %v30_v0, 7  ;;  %s97_s0 = scalar_lea.vmem %s65_s24, 512  ;;  %p102_p9 = scmp.lt.s32.totalorder %s65_s24, %s65_s24 }
  0x15   :  { %p98_p8 = scmp.ne.s32.totalorder %s65_s24, %s97_s0  ;;  %p103_p10 = scmp.lt.s32.totalorder %s97_s0, %s97_s0 }
  0x16   :  { %v32_v2 = vsub.s32 0, %v31_v1  ;;  %v36_v3 = vsub.s32 1, %v31_v1  ;;  %v40_v4 = vsub.s32 2, %v31_v1  ;;  %v44_v5 = vsub.s32 3, %v31_v1 }
  0x17   :  { %p104_p11 = por %p103_p10, %p102_p9 }
  0x18   :  { %v33_v9 = vrot.slane %v28_v7, %v32_v2  ;;  %v37_v10 = vrot.slane %v28_v7, %v36_v3  ;;  %v41_v12 = vrot.slane %v28_v7, %v40_v4  ;;  %v45_v14 = vrot.slane %v28_v7, %v44_v5 }
  0x19   :  { %p105_p12 = pnand %p104_p11, %p98_p8 }
  0x1a   :  { %v50_v15 = vadd.f32 %v33_v9, %v24_v6  ;;  %v51_v16 = vadd.f32 %v37_v10, %v25_v8  ;;  %v52_v17 = vadd.f32 %v41_v12, %v26_v11  ;;  %v53_v18 = vadd.f32 %v45_v14, %v27_v13 }
  0x1c   :  { %54 = vst [vmem:[#allocation5] sm:$0xff] %v50_v15  ;;  %55 = vst [vmem:[#allocation5 + $0x8] sm:$0xff] %v51_v16 }
  0x1d   :  { %56 = vst [vmem:[#allocation5 + $0x10] sm:$0xff] %v52_v17  ;;  %57 = vst [vmem:[#allocation5 + $0x18] sm:$0xff] %v53_v18 }
  0x1e   :  { %108 = shalt.err (!%p105_p12)
}
  0x1f   :  { %s109_s26 = scalar_lea.hbm %s169_s2, 512 }
  0x20   :  { %p110_p13 = scmp.ne.s32.totalorder %s169_s2, %s109_s26  ;;  %p113_p0 = scmp.lt.u32.totalorder %s109_s26, %s169_s2 }
  0x22   :  { %p115_p1 = pnand %p113_p0, %p110_p13 }
  0x24   :  { %118 = shalt.err (!%p115_p1)
}
  0x25   :  { %67 = dma.vmem_to_hbm [thread:$0]  %s65_s24, 512, %s169_s2, [#allocation4]  }
  0x26   :  { %121 = dma.done.wait [#allocation4], 512  }
  0x27   :  { %122 = vsyncadd [#allocation4], 4294966784 }
  0x28   :  { %71 = vsyncpa [#allocation3], 1 }
  0x29   :  { %72 = vsyncpa [#allocation4], 1 }

</bundles_post_ra>
